<compile_context>
chip_gen: v7x
topology: tpu7x:2x2x1
jax: 0.10.0
libtpu: 0.0.40
codegen_flags: <defaults>
</compile_context>

<pallas_src>
import jax
import jax.numpy as jnp
from jax.experimental import pallas as pl
from jax.experimental.pallas import tpu as pltpu


def _genome_kernel(x_ref, w1_ref, b1_ref, w2_ref, b2_ref, w3_ref, b3_ref, o_ref):
    x = x_ref[...]  # (6, tb) feature-major tile; column scaling already in W1

    # L1: (16, 6) @ (6, tb) -> (16, tb).  Batch on the lane axis: lane-dense.
    h1 = jnp.tanh(
        jnp.dot(w1_ref[...], x, preferred_element_type=jnp.float32)
        + b1_ref[...])                                                # (16, tb)

    # L2: (16, 16) @ (16, tb) -> (16, tb), stays on the MXU.
    h2 = jnp.tanh(
        jnp.dot(w2_ref[...], h1, preferred_element_type=jnp.float32)
        + b2_ref[...])                                                # (16, tb)

    # L3 (16 -> 1): VPU multiply + XLU sublane reduce instead of a width-1
    # MXU matmul (both units are otherwise idle here).
    h3 = jnp.tanh(
        jnp.sum(h2 * w3_ref[...], axis=0, keepdims=True) + b3_ref[...])  # (1, tb)

    o_ref[...] = h3.astype(o_ref.dtype)


def _round_up(x, m):
    return (x + m - 1) // m * m


def _pick_tb(B, tb):
    # Lane-aligned tile, clamped to the (rounded-up) batch.
    tb = min(tb, _round_up(B, 128))
    tb = max(128, _round_up(tb, 128))
    # Keep >= 2 grid steps so ("parallel",) can shard across both v7x
    # TensorCores; costs at most one extra ~0.35us step on single-TC chips.
    if B > 128:
        tb = min(tb, _round_up(-(-B // 2), 128))
    return tb


def _prep_params(params):
    # Fold ob[:,0]/=32, ob[:,2]/=50 into W1's input columns:
    # diag(s) x contracted against W1 == x contracted against (W1 diag(s)).
    scale = jnp.array([1.0 / 32.0, 1.0, 1.0 / 50.0, 1.0, 1.0, 1.0], jnp.float32)
    w1 = params["w1"].astype(jnp.float32) * scale[None, :]      # (16, 6)
    b1 = params["b1"].reshape(16, 1).astype(jnp.float32)
    w2 = params["w2"].astype(jnp.float32)                       # (16, 16)
    b2 = params["b2"].reshape(16, 1).astype(jnp.float32)
    w3 = params["w3"].reshape(16, 1).astype(jnp.float32)        # column for VPU bcast
    b3 = params["b3"].reshape(1, 1).astype(jnp.float32)
    return w1, b1, w2, b2, w3, b3


def group_genome_forward_fm(ob_fm, params, *, tb=16384):
    """Performance path.  ob_fm: (6, B) float32 feature-major (producer should
    emit this layout).  Returns lane-dense (1, B) float32."""
    F, B = ob_fm.shape
    assert F == 6, ob_fm.shape
    tb = _pick_tb(B, tb)
    grid = (pl.cdiv(B, tb),)

    w1, b1, w2, b2, w3, b3 = _prep_params(params)

    def const_spec(a):  # full-array block, VMEM-resident across grid steps
        return pl.BlockSpec(a.shape, lambda i: (0,) * a.ndim)

    weight_bytes = 4 * (16 * 6 + 16 + 16 * 16 + 16 + 16 + 1)
    cost = pl.CostEstimate(
        flops=2 * B * (6 * 16 + 16 * 16 + 16),
        transcendentals=33 * B,
        bytes_accessed=4 * (6 * B + B) + weight_bytes,
    )

    out = pl.pallas_call(
        _genome_kernel,
        out_shape=jax.ShapeDtypeStruct((1, B), jnp.float32),
        grid=grid,
        in_specs=[
            pl.BlockSpec((6, tb), lambda i: (0, i)),
            const_spec(w1), const_spec(b1), const_spec(w2), const_spec(b2),
            const_spec(w3), const_spec(b3),
        ],
        out_specs=pl.BlockSpec((1, tb), lambda i: (0, i)),
        compiler_params=pltpu.CompilerParams(
            dimension_semantics=("parallel",)),
        cost_estimate=cost,
    )(ob_fm, w1, b1, w2, b2, w3, b3)

    return out  # (1, B), lane-dense


def group_genome_forward(ob, params, *, tb=16384):
    """PyTorch-contract shim: ob (B, 6) in, (B, 1) out.  The transpose in and
    out are relayouts of a 6-row / 1-column array; prefer
    group_genome_forward_fm when the producer/consumer can cooperate."""
    out = group_genome_forward_fm(ob.T, params, tb=tb)   # (1, B)
    return out.T                                         # (B, 1)


def init_params(key):
    """Deterministic init, PyTorch Linear layout (W is (out, in)) and default
    scale U(-1/sqrt(fan_in), 1/sqrt(fan_in))."""
    ks = jax.random.split(key, 6)

    def lin(kw, kb, fan_in, fan_out):
        bound = 1.0 / jnp.sqrt(jnp.float32(fan_in))
        w = jax.random.uniform(kw, (fan_out, fan_in), jnp.float32, -bound, bound)
        b = jax.random.uniform(kb, (fan_out,), jnp.float32, -bound, bound)
        return w, b

    w1, b1 = lin(ks[0], ks[1], 6, 16)
    w2, b2 = lin(ks[2], ks[3], 16, 16)
    w3, b3 = lin(ks[4], ks[5], 16, 1)
    return {"w1": w1, "b1": b1, "w2": w2, "b2": b2, "w3": w3, "b3": b3}


def _reference(ob, params):
    # Pure-JAX reference of the PyTorch forward (without mutating the input).
    x = ob.at[:, 0].divide(32.0).at[:, 2].divide(50.0)
    h1 = jnp.tanh(x @ params["w1"].T + params["b1"])
    h2 = jnp.tanh(h1 @ params["w2"].T + params["b2"])
    return jnp.tanh(h2 @ params["w3"].T + params["b3"])


if __name__ == "__main__":
    key = jax.random.PRNGKey(0)
    pkey, xkey = jax.random.split(key)
    params = init_params(pkey)

    # Non-multiple-of-128 batch: exercises the ragged last block (no jnp.pad)
    # and, with tb=128, a multi-step pipelined grid.
    B = 300
    ob = jax.random.normal(xkey, (B, 6), jnp.float32) * 10.0
    ref = _reference(ob, params)

    # Feature-major fast path (multi-step grid).
    out_fm = group_genome_forward_fm(ob.T, params, tb=128)   # (1, B)
    out_fm = jax.block_until_ready(out_fm)
    assert out_fm.shape == (1, B), out_fm.shape
    err_fm = float(jnp.max(jnp.abs(out_fm - ref.T)))
    assert jnp.allclose(out_fm, ref.T, atol=1e-5, rtol=1e-5), err_fm

    # PyTorch-contract shim with default tile (>=2-step grid via the tb cap).
    out_bm = group_genome_forward(ob, params)                # (B, 1)
    out_bm = jax.block_until_ready(out_bm)
    assert out_bm.shape == (B, 1), out_bm.shape
    err_bm = float(jnp.max(jnp.abs(out_bm - ref)))
    assert jnp.allclose(out_bm, ref, atol=1e-5, rtol=1e-5), err_bm

    print("KERNEL_OK")
</pallas_src>

<mosaic_0001>
module attributes {stable_mosaic.version = 11 : i64} {
  func.func @_genome_kernel(%arg0: i32, %arg1: memref<6x128xf32, #tpu.memory_space<vmem>>, %arg2: memref<16x6xf32, #tpu.memory_space<vmem>>, %arg3: memref<16x1xf32, #tpu.memory_space<vmem>>, %arg4: memref<16x16xf32, #tpu.memory_space<vmem>>, %arg5: memref<16x1xf32, #tpu.memory_space<vmem>>, %arg6: memref<16x1xf32, #tpu.memory_space<vmem>>, %arg7: memref<1x1xf32, #tpu.memory_space<vmem>>, %arg8: memref<1x128xf32, #tpu.memory_space<vmem>>) attributes {dimension_semantics = [#tpu.dimension_semantics<parallel>], iteration_bounds = array<i64: 3>, scalar_prefetch = 0 : i64, scratch_operands = 0 : i64, tpu.core_type = #tpu.core_type<tc>, window_params = [{transform_indices = @transform_0, window_bounds = array<i64: 6, 128>}, {pipeline_mode = #tpu.pipeline_mode<synchronous>, transform_indices = @transform_1, window_bounds = array<i64: 16, 6>}, {pipeline_mode = #tpu.pipeline_mode<synchronous>, transform_indices = @transform_2, window_bounds = array<i64: 16, 1>}, {pipeline_mode = #tpu.pipeline_mode<synchronous>, transform_indices = @transform_3, window_bounds = array<i64: 16, 16>}, {pipeline_mode = #tpu.pipeline_mode<synchronous>, transform_indices = @transform_4, window_bounds = array<i64: 16, 1>}, {pipeline_mode = #tpu.pipeline_mode<synchronous>, transform_indices = @transform_5, window_bounds = array<i64: 16, 1>}, {pipeline_mode = #tpu.pipeline_mode<synchronous>, transform_indices = @transform_6, window_bounds = array<i64: 1, 1>}, {transform_indices = @transform_7, window_bounds = array<i64: 1, 128>}]} {
    %c0 = arith.constant 0 : index
    %c0_0 = arith.constant 0 : index
    %0 = vector.load %arg1[%c0, %c0_0] : memref<6x128xf32, #tpu.memory_space<vmem>>, vector<6x128xf32>
    %c0_1 = arith.constant 0 : index
    %c0_2 = arith.constant 0 : index
    %1 = vector.load %arg2[%c0_1, %c0_2] : memref<16x6xf32, #tpu.memory_space<vmem>>, vector<16x6xf32>
    %cst = arith.constant dense<0.000000e+00> : vector<16x128xf32>
    %2 = tpu.matmul %1, %0, %cst {dimension_numbers = #tpu.dot_dimension_numbers<[1], [0], [0], [1], [0, 0, 1, 1], [], []>} : vector<16x6xf32>, vector<6x128xf32>, vector<16x128xf32> -> vector<16x128xf32>
    %c0_3 = arith.constant 0 : index
    %c0_4 = arith.constant 0 : index
    %3 = vector.load %arg3[%c0_3, %c0_4] : memref<16x1xf32, #tpu.memory_space<vmem>>, vector<16x1xf32>
    %4 = vector.broadcast %3 : vector<16x1xf32> to vector<16x128xf32>
    %5 = arith.addf %2, %4 : vector<16x128xf32>
    %6 = math.tanh %5 : vector<16x128xf32>
    %c0_5 = arith.constant 0 : index
    %c0_6 = arith.constant 0 : index
    %7 = vector.load %arg4[%c0_5, %c0_6] : memref<16x16xf32, #tpu.memory_space<vmem>>, vector<16x16xf32>
    %cst_7 = arith.constant dense<0.000000e+00> : vector<16x128xf32>
    %8 = tpu.matmul %7, %6, %cst_7 {dimension_numbers = #tpu.dot_dimension_numbers<[1], [0], [0], [1], [0, 0, 1, 1], [], []>} : vector<16x16xf32>, vector<16x128xf32>, vector<16x128xf32> -> vector<16x128xf32>
    %c0_8 = arith.constant 0 : index
    %c0_9 = arith.constant 0 : index
    %9 = vector.load %arg5[%c0_8, %c0_9] : memref<16x1xf32, #tpu.memory_space<vmem>>, vector<16x1xf32>
    %10 = vector.broadcast %9 : vector<16x1xf32> to vector<16x128xf32>
    %11 = arith.addf %8, %10 : vector<16x128xf32>
    %12 = math.tanh %11 : vector<16x128xf32>
    %c0_10 = arith.constant 0 : index
    %c0_11 = arith.constant 0 : index
    %13 = vector.load %arg6[%c0_10, %c0_11] : memref<16x1xf32, #tpu.memory_space<vmem>>, vector<16x1xf32>
    %14 = vector.broadcast %13 : vector<16x1xf32> to vector<16x128xf32>
    %15 = arith.mulf %12, %14 : vector<16x128xf32>
    %cst_12 = arith.constant dense<0.000000e+00> : vector<128xf32>
    %16 = vector.multi_reduction <add>, %15, %cst_12 [0] : vector<16x128xf32> to vector<128xf32>
    %17 = vector.shape_cast %16 : vector<128xf32> to vector<1x128xf32>
    %c0_13 = arith.constant 0 : index
    %c0_14 = arith.constant 0 : index
    %18 = vector.load %arg7[%c0_13, %c0_14] : memref<1x1xf32, #tpu.memory_space<vmem>>, vector<1x1xf32>
    %19 = vector.broadcast %18 : vector<1x1xf32> to vector<1x128xf32>
    %20 = arith.addf %17, %19 : vector<1x128xf32>
    %21 = math.tanh %20 : vector<1x128xf32>
    %c0_15 = arith.constant 0 : index
    %c0_16 = arith.constant 0 : index
    %22 = vector.load %arg8[%c0_15, %c0_16] : memref<1x128xf32, #tpu.memory_space<vmem>>, vector<1x128xf32>
    tpu.vector_store %arg8[%c0_15, %c0_16], %21 {strides = array<i32>} : memref<1x128xf32, #tpu.memory_space<vmem>>, vector<1x128xf32>,
    return
  }
  func.func @transform_0(%arg0: i32) -> (i32, i32) {
    %c0_i32 = arith.constant 0 : i32
    %c0_i32_0 = arith.constant 0 : i32
    return %c0_i32, %arg0 : i32, i32
  }
  func.func @transform_1(%arg0: i32) -> (i32, i32) {
    %c0_i32 = arith.constant 0 : i32
    %c0_i32_0 = arith.constant 0 : i32
    %c0_i32_1 = arith.constant 0 : i32
    return %c0_i32, %c0_i32_0 : i32, i32
  }
  func.func @transform_2(%arg0: i32) -> (i32, i32) {
    %c0_i32 = arith.constant 0 : i32
    %c0_i32_0 = arith.constant 0 : i32
    %c0_i32_1 = arith.constant 0 : i32
    return %c0_i32, %c0_i32_0 : i32, i32
  }
  func.func @transform_3(%arg0: i32) -> (i32, i32) {
    %c0_i32 = arith.constant 0 : i32
    %c0_i32_0 = arith.constant 0 : i32
    %c0_i32_1 = arith.constant 0 : i32
    return %c0_i32, %c0_i32_0 : i32, i32
  }
  func.func @transform_4(%arg0: i32) -> (i32, i32) {
    %c0_i32 = arith.constant 0 : i32
    %c0_i32_0 = arith.constant 0 : i32
    %c0_i32_1 = arith.constant 0 : i32
    return %c0_i32, %c0_i32_0 : i32, i32
  }
  func.func @transform_5(%arg0: i32) -> (i32, i32) {
    %c0_i32 = arith.constant 0 : i32
    %c0_i32_0 = arith.constant 0 : i32
    %c0_i32_1 = arith.constant 0 : i32
    return %c0_i32, %c0_i32_0 : i32, i32
  }
  func.func @transform_6(%arg0: i32) -> (i32, i32) {
    %c0_i32 = arith.constant 0 : i32
    %c0_i32_0 = arith.constant 0 : i32
    %c0_i32_1 = arith.constant 0 : i32
    return %c0_i32, %c0_i32_0 : i32, i32
  }
  func.func @transform_7(%arg0: i32) -> (i32, i32) {
    %c0_i32 = arith.constant 0 : i32
    %c0_i32_0 = arith.constant 0 : i32
    return %c0_i32, %arg0 : i32, i32
  }
}

</mosaic_0001>

<bundles_post_ra>
// kernel: tpu_custom_call.1
= control target key start
LH: loop header
LB: loop body
LE: loop exit
PB: predicated region body
PF: predicated region fallthrough
CT: control target
= control target key end

     0   :  { %s909_s0 = inlined_call_operand.vmem [shape: f32[6,300], index: 0, kind: input, shape index: {}]   ;;  %s910_s1 = inlined_call_operand.vmem [shape: f32[16,6], index: 1, kind: input, shape index: {}]   ;;  %s911_s2 = inlined_call_operand.vmem [shape: f32[16,1], index: 2, kind: input, shape index: {}]   ;;  %s912_s3 = inlined_call_operand.vmem [shape: f32[16,16], index: 3, kind: input, shape index: {}]   ;;  %s913_s4 = inlined_call_operand.vmem [shape: f32[16,1], index: 4, kind: input, shape index: {}]   ;;  %s914_s5 = inlined_call_operand.vmem [shape: f32[16,1], index: 5, kind: input, shape index: {}]   ;;  %s915_s6 = inlined_call_operand.<no memory space> [shape: f32[1,1], index: 6, kind: input, shape index: {}]   ;;  %s916_s7 = inlined_call_operand.hbm [shape: f32[1,300], index: 7, kind: output, shape index: {}]  }
   0x1   :  { %v12_v0 = vstv %s915_s6 }
   0x2   :  { %13 = vst [vmem:[#allocation2] sm:$0x1] %v12_v0 }
   0x3   :  { %14 = vsyncpa [#allocation4], 0 }
   0x4   :  { %16 = vsyncpa [#allocation4 + $0x1], 0  ;;  %s775_s26 = smov 0   ;;  %s777_s27 = smov 0  }
   0x5   :  { %s779_s28 = smov 0   ;;  %s781_s29 = smov 0  }
   0x6 LB: > { %s796_s6 = sadd.s32 4294967295, %s728_s29   ;;  %s578_s30 = sadd.s32 4294967294, %s728_s29   ;;  %s728_s29 = sphi %s781_s29, %s922_s29   ;;  %s724_s28 = sphi %s779_s28, %s921_s28   ;;  %s720_s27 = sphi %s777_s27, %s920_s27   ;;  %s716_s26 = sphi %s775_s26, %s919_s26  }
   0x7   : > { %s800_s8 = sadd.s32 1, %s728_s29   ;;  %s181_s9 = sadd.s32 1, %s724_s28 }
   0x8   : > { %s178_s10 = ssub.s32 %s728_s29, %s800_s8  ;;  %p191_p0 = scmp.ne.s32.totalorder %s724_s28, %s720_s27 }
   0x9   : > { %p179_p1 = scmp.eq.s32.totalorder %s178_s10, 0  ;;  %p192_p2 = scmp.eq.s32.totalorder %s796_s6, 2 }
   0xa   : > { %p197_p3 = scmp.ne.s32.totalorder %s720_s27, %s716_s26  ;;  %p198_p4 = scmp.eq.s32.totalorder %s578_s30, 2 }
   0xb   : > { %s811_s11 = scalar_select %p179_p1, %s724_s28, %s181_s9  }
   0xc   : > { %p813_p5 = por %p192_p2, %p191_p0  ;;  %p817_p6 = por %p198_p4, %p197_p3 }
   0xd   : > { %p581_p7 = scmp.ge.s32.totalorder %s728_s29, 1  ;;  %p241_p8 = scmp.lt.s32.totalorder %s728_s29, 4 }
   0xf   : > { %p242_p9 = pnand %p581_p7, %p241_p8 }
  0x10   : > { %p271_p10 = scmp.lt.s32.totalorder (!%p242_p9), %s796_s6, 2  ;;  %v276_v1 = vld [vmem:[%s910_s1] sm:$0xff] (!%p242_p9)  ;;  %vm290_vm0 = vcmask (!%p242_p9), 48128   ;;  %v730_v2 = vmov (!%p242_p9), 0   ;;  %v279_v4 = vld [vmem:[%s911_s2 + $0x8] sm:$0xff] (!%p242_p9)  ;;  %vm297_vm1 = vcmask (!%p242_p9), 1045504   ;;  %v503_v35 = vlaneseq (!%p242_p9) }
  0x11   : > { %245 = sbr.rel (%p242_p9) target bundleno = 532 (0x214), region = 48  ;;  %600 = vmatprep.mubr.msk.f32.mxu0 (!%p242_p9), %vm290_vm0, %v276_v1  ;;  %654 = vset.pattern.permute.xlu0 (!%p242_p9), %v730_v2  ;;  %v278_v3 = vld [vmem:[%s911_s2] sm:$0xff] (!%p242_p9)  ;;  %v277_v6 = vld [vmem:[%s910_s1 + $0x8] sm:$0xff] (!%p242_p9)  ;;  %vm392_vm2 = vcmask (!%p242_p9), 130048   ;;  %s588_s25 = sshll.u32 (!%p242_p9), %s796_s6, 4 }
  0x12   : > { %282 = vperm.xlu0 (!%p242_p9), %654, %v278_v3   ;;  %655 = vset.pattern.permute.xlu1 (!%p242_p9), %v730_v2  ;;  %v476_v7 = vld [vmem:[%s914_s5] sm:$0xff] (!%p242_p9)  ;;  %v381_v11 = vld [vmem:[%s913_s4 + $0x8] sm:$0xff] (!%p242_p9)  ;;  %v504_v38 = vshrl.u32 (!%p242_p9), %v503_v35, 7  ;;  %s867_s15 = scalar_lea.hbm (!%p242_p9), %s916_s7, %s588_s25 }
  0x13   : > { %v497_v8 = vld [vmem:[#allocation2] sm:$0x1] (!%p242_p9)  ;;  %v477_v12 = vld [vmem:[%s914_s5 + $0x8] sm:$0xff] (!%p242_p9) }
  0x14   : > { %v378_v9 = vld [vmem:[%s912_s3] sm:$0xff] (!%p242_p9)  ;;  %v379_v22 = vld [vmem:[%s912_s3 + $0x8] sm:$0xff] (!%p242_p9)  ;;  %v505_v41 = vsub.s32 (!%p242_p9), 0, %v504_v38 }
  0x15   : > { %607 = vmatprep.mubr.msk.f32.mxu1 (!%p242_p9), %vm392_vm2, %v378_v9  ;;  %v380_v10 = vld [vmem:[%s913_s4] sm:$0xff] (!%p242_p9) }
  0x16   : > { %287 = vperm.xlu0 (!%p242_p9), %654, %v279_v4   ;;  %384 = vperm.xlu1 (!%p242_p9), %655, %v380_v10  }
  0x18   : > { %s272_s18 = scalar_select %p271_p10, %s796_s6, 2 }
  0x19   : > { %s731_s6 = smov [#allocation3]  }
  0x1a   : > { %s582_s21 = sshll.u32 %s272_s18, 3  ;;  %480 = vperm.xlu0 %654, %v476_v7   ;;  %389 = vperm.xlu1 %655, %v381_v11   ;;  %s670_s18 = sshll.u32 %s731_s6, 4  ;;  %s671_s18 = int_to_ptr.vmem [resolvable:$false] %s670_s18 }
  0x1b   : > { %s274_s24 = scalar_lea.vmem %s909_s0, %s582_s21  ;;  %s672_s19 = scalar_lea.vmem %s671_s18, 32 }
  0x1c   : > { %v275_v5 = vld [vmem:[%s274_s24] sm:$0x3f]  ;;  %s269_s24 = sand.u32 1, %s720_s27  }
  0x1d   : > { %598 = vmatprep.subr.msk.mxu0 %vm297_vm1, %v275_v5  ;;  %s270_s30 = scalar_lea.vmem [#allocation3], %s269_s24  ;;  %s511_s16 = scalar_lea.sflag [#allocation4], %s269_s24 }
  0x1e   : > { %599 = vmatpush3.msk.msra.mxu0 %vm297_vm1, %v275_v5  ;;  %500 = vperm.xlu0 %654, %v497_v8   ;;  %s523_s9 = sshll.u32 %s270_s30, 4  ;;  %s869_s9 = int_to_ptr.vmem [resolvable:$true] %s523_s9 }
  0x1f   : > { %601 = vmatmul.mubr.msk.f32.vlgmr.msra.gmra.mrb[0].mxu0 %vm290_vm0, %v277_v6  ;;  %485 = vperm.xlu1 %655, %v477_v12   ;;  %s666_s17 = scalar_lea.vmem %s869_s9, 16  ;;  %p673_p0 = scmp.lt.s32.totalorder %s869_s9, %s671_s18 }
  0x20   : > { %p667_p11 = scmp.ne.s32.totalorder %s869_s9, %s666_s17  ;;  %p674_p1 = scmp.lt.s32.totalorder %s672_s19, %s666_s17 }
  0x22   : > { %p668_p12 = pnand %p667_p11, %p813_p5  ;;  %p675_p2 = por %p674_p1, %p673_p0 }
  0x24   : > { %p669_p13 = pneg %p668_p12 }
  0x26   : > { %p676_p3 = pnand %p675_p2, %p669_p13 }
  0x91   : > { %v283_v13 = vpop.permute.xlu0 %282 }
  0x95   : > { %v288_v14 = vpop.permute.xlu0 %287  ;;  %v385_v23 = vpop.permute.xlu1 %384 }
  0x99   : > { %v390_v24 = vpop.permute.xlu1 %389  ;;  %v481_v32 = vpop.permute.xlu0 %480 }
  0x9d   : > { %v501_v43 = vpop.permute.xlu0 %500 }
  0x9e   : > { %v486_v30 = vpop.permute.xlu1 %485  ;;  %v506_v45 = vrot.slane %v501_v43, %v505_v41 }
  0xf2   : > { %v602_v15 = vpop.f32.mrb[0].mxu0 }
  0xf3   : > { %v373_v16 = vadd.f32 %v602_v15, %v288_v14  ;;  %v367_v17 = vpop.f32.mrb[1].mxu0 }
  0xf4   : > { %v368_v18 = vadd.f32 %v367_v17, %v283_v13 }
  0xf5   : > { %656 = vtanh.f32 %v373_v16 }
  0xf6   : > { %658 = vtanh.f32 %v368_v18 }
  0xff   : > { %v657_v19 = vpop.eup %656 }
 0x100   : > { %v659_v20 = vpop.eup %658 }
 0x101   : > { %v610_v21 = vpack.c.bf16 %v657_v19, %v659_v20 }
 0x103   : > { %611 = vmatprep.subr.bf16.mxu1 %v610_v21 }
 0x104   : > { %613 = vmatpush3.bf16.msra.mxu1 %v610_v21 }
 0x107   : > { %608 = vmatmul.mubr.msk.f32.vlgmr.msra.gmra.mrb[0].mxu1 %vm392_vm2, %v379_v22 }
 0x1da   : > { %v609_v25 = vpop.f32.mrb[0].mxu1 }
 0x1db   : > { %v471_v26 = vadd.f32 %v609_v25, %v390_v24  ;;  %v465_v27 = vpop.f32.mrb[1].mxu1 }
 0x1dc   : > { %v466_v28 = vadd.f32 %v465_v27, %v385_v23 }
 0x1dd   : > { %660 = vtanh.f32 %v471_v26 }
 0x1de   : > { %662 = vtanh.f32 %v466_v28 }
 0x1e7   : > { %v661_v29 = vpop.eup %660 }
 0x1e8   : > { %v663_v31 = vpop.eup %662  ;;  %v489_v33 = vmul.f32 %v661_v29, %v486_v30 }
 0x1e9   : > { %v488_v34 = vmul.f32 %v663_v31, %v481_v32 }
 0x1eb   : > { %v490_v36 = vadd.f32 %v489_v33, %v488_v34 }
 0x1ed   : > { %v491_v37 = vrot.slane %v490_v36, 4 }
 0x1ef   : > { %v492_v39 = vadd.f32 %v491_v37, %v490_v36 }
 0x1f1   : > { %v493_v40 = vrot.slane %v492_v39, 2 }
 0x1f3   : > { %v494_v42 = vadd.f32 %v493_v40, %v492_v39 }
 0x1f5   : > { %v495_v44 = vrot.slane %v494_v42, 1 }
 0x1f7   : > { %v496_v46 = vadd.f32 %v495_v44, %v494_v42 }
 0x1f9   : > { %v507_v47 = vadd.f32 %v506_v45, %v496_v46 }
 0x1fb   : > { %664 = vtanh.f32 %v507_v47 }
 0x205   : > { %v665_v48 = vpop.eup %664 }
 0x206   : > { %509 = vst [vmem:[%s270_s30] sm:$0x1] %v665_v48 }
 0x207   : > { %679 = shalt.err (!%p676_p3)
}
 0x208   : > { %s680_s20 = scalar_lea.hbm %s867_s15, 16  ;;  %s684_s23 = scalar_lea.hbm %s916_s7, 48 }
 0x209   : > { %p681_p4 = scmp.ne.s32.totalorder %s867_s15, %s680_s20  ;;  %p685_p9 = scmp.lt.u32.totalorder %s867_s15, %s916_s7 }
 0x20a   : > { %p686_p10 = scmp.lt.u32.totalorder %s684_s23, %s680_s20  ;;  %p688_p12 = scmp.lt.u32.totalorder %s680_s20, %s867_s15 }
 0x20b   : > { %p682_p7 = pnand %p681_p4, %p813_p5 }
 0x20c   : > { %p687_p11 = por %p686_p10, %p685_p9 }
 0x20d   : > { %p683_p8 = pneg %p682_p7 }
 0x20e   : > { %p689_p13 = por %p688_p12, %p687_p11 }
 0x210   : > { %p690_p0 = pnand %p689_p13, %p683_p8 }
 0x212   : > { %693 = shalt.err (!%p690_p0)
}
 0x213   : > { %614 = dma.vmem_to_hbm [thread:$0]  (%p813_p5), %s869_s9, 16, %s867_s15, %s511_s16  }
 0x214 PF: > { %p620_p1 = scmp.ge.s32.totalorder %s728_s29, 2  ;;  %s535_s30 = sand.u32 1, %s716_s26  }
 0x215   : > { %s536_s10 = scalar_lea.sflag [#allocation4], %s535_s30 }
 0x216   : > { %p617_p2 = pnand %p620_p1, %p817_p6 }
 0x218   : > { %711 = dma.done.wait (!%p617_p2), %s536_s10, 16  }
 0x219   : > { %713 = vsyncadd (!%p617_p2), %s536_s10, 4294967280  ;;  %p19_p3 = scmp.ge.s32.totalorder %s800_s8, 5   ;;  %s919_s26 = smov %s720_s27 }
 0x21a   : > { %s920_s27 = smov %s724_s28  ;;  %s921_s28 = smov %s811_s11 }
 0x21b   : > { %s922_s29 = smov %s800_s8  ;;  %21 = sbr.rel (!%p19_p3) target bundleno = 6 (0x6), region = 83 }
 0x222   :  { %540 = vsyncpa [#allocation4], 1 }
 0x223   :  { %542 = vsyncpa [#allocation4 + $0x1], 1 }

</bundles_post_ra>
